<compile_context>
chip_gen: v6e
topology: v6e:2x2x1
jax: 0.10.0
libtpu: 0.0.40
codegen_flags: <defaults>
</compile_context>

<pallas_src>
import functools

import jax
import jax.numpy as jnp
from jax.experimental import pallas as pl
from jax.experimental.pallas import tpu as pltpu


def _mm_cat4_kernel(xin_ref, o_ref, *, k, n, reps):
    # Single packed input tile: xin = [x1 | x2], shape (M, K + N) with M == K.
    xin = xin_ref[...].astype(jnp.float32)  # one up-front cast per call (v5e note)
    x1 = xin[:, :k]          # (M, K)
    x2 = xin[:, k:k + n]     # (K, N)   (valid because M == K in the packed layout)

    # v1[m, j] = sum_k x1[m, k] * x2[k, j] as K broadcast FMAs, unrolled at
    # trace time (K == 2 here).  x1-column broadcast is cross-lane (XLU),
    # x2-row broadcast is a cheap stride-0 sublane read.
    v1 = x1[:, 0:1] * x2[0:1, :]
    for j in range(1, k):
        v1 = v1 + x1[:, j:j + 1] * x2[j:j + 1, :]

    # cat([v1] * 4, dim=1): build the full (M, 4N) tile in-register and do a
    # single full-tile store (one vst, no per-slice masked stores).
    o_ref[...] = jnp.concatenate([v1] * reps, axis=1).astype(o_ref.dtype)


def mm_cat4(x1: jax.Array, x2: jax.Array, reps: int = 4) -> jax.Array:
    """Computes cat([x1 @ x2] * reps, axis=1) in one Pallas kernel."""
    m, k = x1.shape
    k2, n = x2.shape
    assert k == k2, "inner dims must match"
    # Packed single-DMA layout needs matching row counts; true for the
    # module's fixed (2, 2) @ (2, 2) shapes.
    assert m == k2, "packed single-DMA layout assumes x1.shape[0] == x2.shape[0]"

    out_dtype = jnp.result_type(x1.dtype, x2.dtype)
    xin = jnp.concatenate([x1.astype(out_dtype), x2.astype(out_dtype)], axis=1)  # (M, K+N)

    kernel = functools.partial(_mm_cat4_kernel, k=k, n=n, reps=reps)
    return pl.pallas_call(
        kernel,
        out_shape=jax.ShapeDtypeStruct((m, reps * n), out_dtype),
        in_specs=[pl.BlockSpec(memory_space=pltpu.MemorySpace.VMEM)],
        out_specs=pl.BlockSpec(memory_space=pltpu.MemorySpace.VMEM),
    )(xin)


if __name__ == "__main__":
    key = jax.random.PRNGKey(0)
    key1, key2 = jax.random.split(key)
    # Shapes implied by the module: x1, x2 are (2, 2).
    x1 = jax.random.normal(key1, (2, 2), dtype=jnp.float32)
    x2 = jax.random.normal(key2, (2, 2), dtype=jnp.float32)

    out = mm_cat4(x1, x2)
    out = jax.block_until_ready(out)

    # Reference check (plain JAX).
    v1 = x1 @ x2
    ref = jnp.concatenate([v1, v1, v1, v1], axis=1)
    assert out.shape == (2, 8), out.shape
    assert jnp.allclose(out, ref, atol=1e-5, rtol=1e-5), "mismatch vs reference"

    print("KERNEL_OK")
</pallas_src>

<mosaic_0001>
module attributes {stable_mosaic.version = 11 : i64} {
  func.func @_mm_cat4_kernel(%arg0: memref<2x4xf32, #tpu.memory_space<vmem>>, %arg1: memref<2x8xf32, #tpu.memory_space<vmem>>) attributes {dimension_semantics = [], scalar_prefetch = 0 : i64, scratch_operands = 0 : i64, tpu.core_type = #tpu.core_type<tc>} {
    %c0 = arith.constant 0 : index
    %c0_0 = arith.constant 0 : index
    %0 = vector.load %arg0[%c0, %c0_0] : memref<2x4xf32, #tpu.memory_space<vmem>>, vector<2x4xf32>
    %1 = vector.extract_strided_slice %0 {offsets = [0, 0], sizes = [2, 2], strides = [1, 1]} : vector<2x4xf32> to vector<2x2xf32>
    %2 = vector.extract_strided_slice %0 {offsets = [0, 2], sizes = [2, 2], strides = [1, 1]} : vector<2x4xf32> to vector<2x2xf32>
    %3 = vector.extract_strided_slice %1 {offsets = [0, 0], sizes = [2, 1], strides = [1, 1]} : vector<2x2xf32> to vector<2x1xf32>
    %4 = vector.extract_strided_slice %2 {offsets = [0, 0], sizes = [1, 2], strides = [1, 1]} : vector<2x2xf32> to vector<1x2xf32>
    %5 = vector.broadcast %3 : vector<2x1xf32> to vector<2x2xf32>
    %6 = vector.broadcast %4 : vector<1x2xf32> to vector<2x2xf32>
    %7 = arith.mulf %5, %6 : vector<2x2xf32>
    %8 = vector.extract_strided_slice %1 {offsets = [0, 1], sizes = [2, 1], strides = [1, 1]} : vector<2x2xf32> to vector<2x1xf32>
    %9 = vector.extract_strided_slice %2 {offsets = [1, 0], sizes = [1, 2], strides = [1, 1]} : vector<2x2xf32> to vector<1x2xf32>
    %10 = vector.broadcast %8 : vector<2x1xf32> to vector<2x2xf32>
    %11 = vector.broadcast %9 : vector<1x2xf32> to vector<2x2xf32>
    %12 = arith.mulf %10, %11 : vector<2x2xf32>
    %13 = arith.addf %7, %12 : vector<2x2xf32>
    %14 = tpu.concatenate %13, %13, %13, %13 in 1 : vector<2x2xf32>, vector<2x2xf32>, vector<2x2xf32>, vector<2x2xf32> -> vector<2x8xf32>
    %c0_1 = arith.constant 0 : index
    %c0_2 = arith.constant 0 : index
    %15 = vector.load %arg1[%c0_1, %c0_2] : memref<2x8xf32, #tpu.memory_space<vmem>>, vector<2x8xf32>
    tpu.vector_store %arg1[%c0_1, %c0_2], %14 {strides = array<i32>} : memref<2x8xf32, #tpu.memory_space<vmem>>, vector<2x8xf32>,
    return
  }
}

</mosaic_0001>

<bundles_post_ra>
// kernel: tpu_custom_call.1
= control target key start
LH: loop header
LB: loop body
LE: loop exit
PB: predicated region body
PF: predicated region fallthrough
CT: control target
= control target key end

     0   :  { %6 = vsyncpa [#allocation3], 0  ;;  %s151_s0 = inlined_call_operand.hbm [shape: f32[2,4], index: 0, kind: input, shape index: {}]   ;;  %s152_s1 = inlined_call_operand.hbm [shape: f32[2,8], index: 1, kind: output, shape index: {}]  }
   0x1   :  { %7 = vsyncpa [#allocation4], 0  ;;  %s128_s6 = smov [#allocation2]  }
   0x2   :  { %s14_s7 = sshll.u32 %s128_s6, 4  ;;  %s15_s7 = int_to_ptr.vmem [resolvable:$true] %s14_s7 }
   0x3   :  { %s92_s8 = scalar_lea.vmem %s15_s7, 32  ;;  %p97_p1 = scmp.lt.s32.totalorder %s15_s7, %s15_s7 }
   0x4   :  { %p93_p0 = scmp.ne.s32.totalorder %s15_s7, %s92_s8  ;;  %p98_p2 = scmp.lt.s32.totalorder %s92_s8, %s92_s8 }
   0x6   :  { %p99_p3 = por %p98_p2, %p97_p1 }
   0x8   :  { %p100_p4 = pnand %p99_p3, %p93_p0 }
   0xa   :  { %103 = shalt.err (!%p100_p4)
}
   0xb   :  { %17 = dma.hbm_to_vmem [thread:$0]  %s151_s0, 32, %s15_s7, [#allocation3]  }
   0xc   :  { %124 = dma.done.wait [#allocation3], 32  }
   0xd   :  { %125 = vsyncadd [#allocation3], 4294967264  ;;  %v129_v0 = vmov 0   ;;  %v21_v1 = vld [vmem:[#allocation2] sm:$0x3]  ;;  %v130_v2 = vmov 1   ;;  %v27_v3 = vlaneseq }
   0xe   :  { %82 = vset.pattern.permute.xlu0 %v129_v0  ;;  %s131_s0 = smov 126   ;;  %s132_s11 = smov 2   ;;  %vm52_vm0 = vcmask 15360   ;;  %vm54_vm1 = vcmask 31744   ;;  %vm56_vm2 = vcmask 48128   ;;  %vm58_vm3 = vcmask 58368  }
   0xf   :  { %24 = vperm.xlu0 %82, %v21_v1   ;;  %v28_v4 = vshrl.u32 %v27_v3, 7  ;;  %s133_s12 = smov 4   ;;  %s134_s13 = smov [#allocation5]  }
  0x10   :  { %s66_s14 = sshll.u32 %s134_s13, 4  ;;  %s67_s14 = int_to_ptr.vmem [resolvable:$true] %s66_s14 }
  0x11   :  { %v29_v5 = vsub.s32 0, %v28_v4  ;;  %v38_v6 = vsub.s32 1, %v28_v4  ;;  %s104_s15 = scalar_lea.vmem %s67_s14, 32  ;;  %p109_p6 = scmp.lt.s32.totalorder %s67_s14, %s67_s14 }
  0x12   :  { %p105_p5 = scmp.ne.s32.totalorder %s67_s14, %s104_s15  ;;  %p110_p7 = scmp.lt.s32.totalorder %s104_s15, %s104_s15 }
  0x13   :  { %83 = vset.pattern.permute.xlu0 %v130_v2  ;;  %v30_v8 = vrot.slane %v21_v1, %v29_v5  ;;  %v39_v9 = vrot.slane %v21_v1, %v38_v6 }
  0x14   :  { %33 = vperm.xlu0 %83, %v21_v1   ;;  %p111_p8 = por %p110_p7, %p109_p6 }
  0x16   :  { %p112_p9 = pnand %p111_p8, %p105_p5 }
  0x8a   :  { %v25_v7 = vpop.permute.xlu0 %24 }
  0x8b   :  { %v31_v11 = vmul.f32 %v30_v8, %v25_v7 }
  0x8f   :  { %v34_v10 = vpop.permute.xlu0 %33 }
  0x90   :  { %v40_v12 = vmul.f32 %v39_v9, %v34_v10 }
  0x92   :  { %v41_v13 = vadd.f32 %v40_v12, %v31_v11 }
  0x94   :  { %43 = vrot.lane.b32.xlu1 %v41_v13, %s131_s0 }
  0x98   :  { %46 = vrot.lane.b32.xlu1 %v41_v13, %s132_s11 }
  0x9c   :  { %49 = vrot.lane.b32.xlu1 %v41_v13, %s133_s12 }
 0x106   :  { %v44_v14 = vpop.permute.xlu1 %43 }
 0x107   :  { %v53_v16 = vsel %vm52_vm0, %v44_v14, %v41_v13 }
 0x10a   :  { %v47_v15 = vpop.permute.xlu1 %46 }
 0x10b   :  { %v55_v17 = vsel %vm54_vm1, %v53_v16, %v47_v15 }
 0x10e   :  { %v50_v18 = vpop.permute.xlu1 %49 }
 0x10f   :  { %v57_v19 = vsel %vm56_vm2, %v55_v17, %v50_v18 }
 0x110   :  { %59 = vst.msk [vmem:[#allocation5] sm:$0x3] %vm58_vm3, %v57_v19 }
 0x111   :  { %115 = shalt.err (!%p112_p9)
}
 0x112   :  { %69 = dma.vmem_to_hbm [thread:$0]  %s67_s14, 32, %s152_s1, [#allocation4]  }
 0x113   :  { %126 = dma.done.wait [#allocation4], 32  }
 0x114   :  { %127 = vsyncadd [#allocation4], 4294967264 }
 0x115   :  { %73 = vsyncpa [#allocation3], 1 }
 0x116   :  { %74 = vsyncpa [#allocation4], 1 }

</bundles_post_ra>
